<compile_context>
chip_gen: v6e
topology: v6e:2x2x1
jax: 0.10.0
libtpu: 0.0.40
codegen_flags: <defaults>
</compile_context>

<pallas_src>
import functools

import numpy as np
import jax
import jax.numpy as jnp
from jax.experimental import pallas as pl
from jax.experimental.pallas import tpu as pltpu


# ---------------------------------------------------------------------------
# Pallas kernel: one grid step == one TransformerEncoderLayer applied to one
# batch block of NB sequences.  The activation is resident in out_ref.
# ---------------------------------------------------------------------------
def bert_stack_kernel(x_ref, kbias_ref, wqkv_ref, bqkv_ref, wo_ref,
                      w1_ref, b1_ref, w2_ref, vec_ref, out_ref, *, num_heads):
    layer = pl.program_id(1)

    # Layer 0: seed the resident activation for this batch block.
    @pl.when(layer == 0)
    def _():
        out_ref[...] = x_ref[...]

    x = out_ref[...]                      # (NB, S, H) fp32, VMEM-resident
    NB, S, H = x.shape
    h = num_heads
    dk = H // h
    bf16 = jnp.bfloat16

    # Packed per-layer vectors: rows = [bo, g1, be1, b2, g2, be2, pad, pad]
    vec = vec_ref[0]                      # (8, H) fp32
    bo, g1, be1 = vec[0:1], vec[1:2], vec[2:3]
    b2, g2, be2 = vec[3:4], vec[4:5], vec[5:6]

    x2d = x.reshape(NB * S, H)            # free leading-dims merge

    # --- fused QKV projection: one lane-dense (NB*S,H) @ (H,3H) matmul -----
    # (1/sqrt(dk) is already folded into the Q columns / bias on the host.)
    qkv = jnp.dot(x2d.astype(bf16), wqkv_ref[0],
                  preferred_element_type=jnp.float32) + bqkv_ref[0]
    qkv = qkv.astype(bf16)                # bf16 immediately after the bias add

    def split_heads(y2d):                 # (NB*S, H) -> (h*NB, S, dk)
        y3 = y2d.reshape(NB, S, H)        # free leading split
        return jnp.concatenate(
            [y3[:, :, i * dk:(i + 1) * dk] for i in range(h)], axis=0)

    qm = split_heads(qkv[:, 0:H])         # (h*NB, S, dk) bf16
    km = split_heads(qkv[:, H:2 * H])
    vm = split_heads(qkv[:, 2 * H:3 * H])

    # --- per-sequence multi-head attention (batch dim = h*NB) --------------
    s = jnp.einsum('bqd,bkd->bqk', qm, km,
                   preferred_element_type=jnp.float32)          # (h*NB, S, S)
    kb = kbias_ref[...]                                         # (NB, 1, S) f32
    kb_full = jnp.broadcast_to(kb[None], (h, NB, 1, S)).reshape(h * NB, 1, S)
    s = s + kb_full                       # additive key-padding mask, fp32
    m = jnp.max(s, axis=-1, keepdims=True)
    e = jnp.exp(s - m)
    p = e * pl.reciprocal(jnp.sum(e, axis=-1, keepdims=True), approx=True)
    ctx = jnp.einsum('bqk,bkd->bqd', p.astype(bf16), vm,
                     preferred_element_type=jnp.float32)        # (h*NB, S, dk)

    # --- output projection: concat heads back into lanes, one (H,H) matmul --
    ctx_b = ctx.astype(bf16)
    ctx_cat = jnp.concatenate(
        [ctx_b[i * NB:(i + 1) * NB] for i in range(h)], axis=-1)  # (NB, S, H)
    x_att = jnp.dot(ctx_cat.reshape(NB * S, H), wo_ref[0],
                    preferred_element_type=jnp.float32) + bo      # (NB*S, H)

    def layer_norm(v, g, b):
        mu = jnp.mean(v, axis=-1, keepdims=True)
        c = v - mu
        var = jnp.mean(c * c, axis=-1, keepdims=True)   # two-pass variance
        return c * jax.lax.rsqrt(var + 1e-5) * g + b

    # x = norm1(x + dropout1(x_att));  dropout rate 0.0 -> identity
    x1 = layer_norm(x2d + x_att, g1, be1)

    # Feed-forward: linear2(relu(linear1(x)))
    hid = jnp.maximum(
        jnp.dot(x1.astype(bf16), w1_ref[0],
                preferred_element_type=jnp.float32) + b1_ref[0], 0.0)
    x_ff = jnp.dot(hid.astype(bf16), w2_ref[0],
                   preferred_element_type=jnp.float32) + b2

    # x = norm2(x1 + dropout3(x_ff))  -> becomes next layer's input
    out_ref[...] = layer_norm(x1 + x_ff, g2, be2).reshape(NB, S, H)


# ---------------------------------------------------------------------------
# Wrapper: single pallas_call over (batch blocks, layers).
# ---------------------------------------------------------------------------
def _vmem_limit_bytes(NB, S, H, FF, heads):
    bf, f32 = 2, 4
    w_blk = (H * 3 * H + H * H + H * FF + FF * H) * bf \
        + (3 * H + FF + 8 * H) * f32                     # per-layer weights
    io_blk = (2 * NB * S * H + NB * S) * f32             # seed + out + mask
    interm = (NB * S * 3 * H + 2 * heads * NB * S * S
              + NB * S * FF + 6 * NB * S * H) * f32      # largest live set
    need = 2 * (w_blk + io_blk) + interm + (8 << 20)     # 2x = double buffer
    return int(min(need, 100 * 1024 * 1024))


def run_encoder_stack(x, key_bias, sp, num_heads, batch_blocks=None):
    N, S, H = x.shape
    L = sp["wqkv"].shape[0]
    FF = sp["w1"].shape[-1]
    if batch_blocks is None:
        # >= 2 blocks lets v7x's two TensorCores split the parallel batch axis.
        batch_blocks = 2 if (N >= 2 and N % 2 == 0) else 1
    NB = N // batch_blocks

    kernel = functools.partial(bert_stack_kernel, num_heads=num_heads)
    out = pl.pallas_call(
        kernel,
        out_shape=jax.ShapeDtypeStruct((N, S, H), jnp.float32),
        grid_spec=pltpu.PrefetchScalarGridSpec(
            num_scalar_prefetch=0,
            grid=(batch_blocks, L),   # layer axis innermost: weights stream,
                                      # activation block stays VMEM-resident.
            in_specs=[
                pl.BlockSpec((NB, S, H), lambda b, l: (b, 0, 0)),      # x seed
                pl.BlockSpec((NB, 1, S), lambda b, l: (b, 0, 0)),      # key bias
                pl.BlockSpec((1, H, 3 * H), lambda b, l: (l, 0, 0)),   # Wqkv
                pl.BlockSpec((1, 1, 3 * H), lambda b, l: (l, 0, 0)),   # bqkv
                pl.BlockSpec((1, H, H), lambda b, l: (l, 0, 0)),       # Wo
                pl.BlockSpec((1, H, FF), lambda b, l: (l, 0, 0)),      # W1
                pl.BlockSpec((1, 1, FF), lambda b, l: (l, 0, 0)),      # b1
                pl.BlockSpec((1, FF, H), lambda b, l: (l, 0, 0)),      # W2
                pl.BlockSpec((1, 8, H), lambda b, l: (l, 0, 0)),       # packed vecs
            ],
            out_specs=pl.BlockSpec((NB, S, H), lambda b, l: (b, 0, 0)),
        ),
        compiler_params=pltpu.CompilerParams(
            dimension_semantics=("parallel", "arbitrary"),
            vmem_limit_bytes=_vmem_limit_bytes(NB, S, H, FF, num_heads)),
    )(x.astype(jnp.float32), key_bias, sp["wqkv"], sp["bqkv"], sp["wo"],
      sp["w1"], sp["b1"], sp["w2"], sp["vec"])
    return out


# ---------------------------------------------------------------------------
# Plain-JAX glue: mask construction, embeddings, parameter construction.
# ---------------------------------------------------------------------------
def build_key_bias(token_ids):
    """(N, 1, S) additive attention bias: 0 for valid keys (token > 0),
    -1e9 for padding keys — matches PyTorch masked_fill(mask == 0, -1e9)."""
    return jnp.where(token_ids > 0, 0.0, -1e9).astype(jnp.float32)[:, None, :]


def sinusoidal_position_embedding(max_len, d_model):
    pos = np.arange(max_len)[:, None].astype(np.float64)
    i = np.arange(d_model)[None, :].astype(np.float64)
    angle = pos / np.power(10000.0, (2.0 * (i // 2)) / d_model)
    pe = np.where(i % 2 == 0, np.sin(angle), np.cos(angle))
    return jnp.asarray(pe, dtype=jnp.float32)


def init_layer_params(key, hidden, ff_hidden):
    ks = jax.random.split(key, 6)
    std = 0.02
    return {
        "wq": jax.random.normal(ks[0], (hidden, hidden), jnp.float32) * std,
        "bq": jnp.zeros((1, hidden), jnp.float32),
        "wk": jax.random.normal(ks[1], (hidden, hidden), jnp.float32) * std,
        "bk": jnp.zeros((1, hidden), jnp.float32),
        "wv": jax.random.normal(ks[2], (hidden, hidden), jnp.float32) * std,
        "bv": jnp.zeros((1, hidden), jnp.float32),
        "wo": jax.random.normal(ks[3], (hidden, hidden), jnp.float32) * std,
        "bo": jnp.zeros((1, hidden), jnp.float32),
        "g1": jnp.ones((1, hidden), jnp.float32),
        "be1": jnp.zeros((1, hidden), jnp.float32),
        "w1": jax.random.normal(ks[4], (hidden, ff_hidden), jnp.float32) * std,
        "b1": jnp.zeros((1, ff_hidden), jnp.float32),
        "w2": jax.random.normal(ks[5], (ff_hidden, hidden), jnp.float32) * std,
        "b2": jnp.zeros((1, hidden), jnp.float32),
        "g2": jnp.ones((1, hidden), jnp.float32),
        "be2": jnp.zeros((1, hidden), jnp.float32),
    }


def stack_layer_params(layers, num_heads):
    """Stack per-layer params into (L, ...) arrays laid out for the kernel."""
    H = layers[0]["wq"].shape[0]
    dk = H // num_heads
    scale = jnp.float32(1.0 / np.sqrt(dk))

    wqkv, bqkv, wo, w1, b1, w2, vec = [], [], [], [], [], [], []
    for lp in layers:
        # 1/sqrt(dk) softmax scale folded into the Q projection (host-side).
        wqkv.append(jnp.concatenate(
            [lp["wq"] * scale, lp["wk"], lp["wv"]], axis=1))      # (H, 3H)
        bqkv.append(jnp.concatenate(
            [lp["bq"] * scale, lp["bk"], lp["bv"]], axis=1))      # (1, 3H)
        wo.append(lp["wo"])                                       # (H, H)
        w1.append(lp["w1"])
        b1.append(lp["b1"])
        w2.append(lp["w2"])
        vec.append(jnp.concatenate(
            [lp["bo"], lp["g1"], lp["be1"], lp["b2"], lp["g2"], lp["be2"],
             jnp.zeros((2, H), jnp.float32)], axis=0))            # (8, H)

    return {
        "wqkv": jnp.stack(wqkv).astype(jnp.bfloat16),   # (L, H, 3H)
        "bqkv": jnp.stack(bqkv),                        # (L, 1, 3H) f32
        "wo":   jnp.stack(wo).astype(jnp.bfloat16),     # (L, H, H)
        "w1":   jnp.stack(w1).astype(jnp.bfloat16),     # (L, H, FF)
        "b1":   jnp.stack(b1),                          # (L, 1, FF) f32
        "w2":   jnp.stack(w2).astype(jnp.bfloat16),     # (L, FF, H)
        "vec":  jnp.stack(vec),                         # (L, 8, H) f32
    }


def init_bert_params(key, vocab_size, hidden, n_layers, attn_heads, max_len):
    k_tok, k_layers = jax.random.split(key)
    tok_emb = jax.random.normal(k_tok, (vocab_size, hidden), jnp.float32) * 0.02
    tok_emb = tok_emb.at[0].set(0.0)  # padding_idx=0 -> zero vector
    pos_emb = sinusoidal_position_embedding(max_len, hidden)
    layer_keys = jax.random.split(k_layers, n_layers)
    layers = [init_layer_params(k, hidden, 4 * hidden) for k in layer_keys]
    return {"tok_emb": tok_emb, "pos_emb": pos_emb,
            "stacked": stack_layer_params(layers, attn_heads)}


def bert_forward(token_ids, params, num_heads):
    """token_ids: (N, S) int32.  Returns (N, S, H) float32."""
    N, S = token_ids.shape
    # BERTEmbedding (seq_mode='one', abs_position_embed=True, segment_info=None)
    x = params["tok_emb"][token_ids] + params["pos_emb"][:S][None, :, :]
    key_bias = build_key_bias(token_ids)
    return run_encoder_stack(x, key_bias, params["stacked"], num_heads)


# ---------------------------------------------------------------------------
if __name__ == "__main__":
    VOCAB = 50
    HIDDEN = 32
    N_LAYERS = 2
    ATTN_HEADS = 4
    BATCH = 2
    SEQ = 8

    key = jax.random.PRNGKey(0)
    k_param, k_tok = jax.random.split(key)

    params = init_bert_params(k_param, VOCAB, HIDDEN, N_LAYERS, ATTN_HEADS,
                              max_len=64)

    token_ids = jax.random.randint(k_tok, (BATCH, SEQ), 1, VOCAB, dtype=jnp.int32)
    token_ids = token_ids.at[1, -2:].set(0)   # padding at the end of row 1

    out = bert_forward(token_ids, params, ATTN_HEADS)
    out = jax.block_until_ready(out)
    assert out.shape == (BATCH, SEQ, HIDDEN) and out.dtype == jnp.float32
    assert bool(jnp.all(jnp.isfinite(out)))
    print("KERNEL_OK")
</pallas_src>

<mosaic_0001>
module attributes {stable_mosaic.version = 11 : i64} {
  func.func @bert_stack_kernel(%arg0: i32, %arg1: i32, %arg2: memref<1x8x32xf32, #tpu.memory_space<vmem>>, %arg3: memref<1x1x8xf32, #tpu.memory_space<vmem>>, %arg4: memref<1x32x96xbf16, #tpu.memory_space<vmem>>, %arg5: memref<1x1x96xf32, #tpu.memory_space<vmem>>, %arg6: memref<1x32x32xbf16, #tpu.memory_space<vmem>>, %arg7: memref<1x32x128xbf16, #tpu.memory_space<vmem>>, %arg8: memref<1x1x128xf32, #tpu.memory_space<vmem>>, %arg9: memref<1x128x32xbf16, #tpu.memory_space<vmem>>, %arg10: memref<1x8x32xf32, #tpu.memory_space<vmem>>, %arg11: memref<1x8x32xf32, #tpu.memory_space<vmem>>) attributes {dimension_semantics = [#tpu.dimension_semantics<parallel>, #tpu.dimension_semantics<arbitrary>], iteration_bounds = array<i64: 2, 2>, scalar_prefetch = 0 : i64, scratch_operands = 0 : i64, tpu.core_type = #tpu.core_type<tc>, window_params = [{transform_indices = @transform_0, window_bounds = array<i64: 1, 8, 32>}, {transform_indices = @transform_1, window_bounds = array<i64: 1, 1, 8>}, {transform_indices = @transform_2, window_bounds = array<i64: 1, 32, 96>}, {transform_indices = @transform_3, window_bounds = array<i64: 1, 1, 96>}, {transform_indices = @transform_4, window_bounds = array<i64: 1, 32, 32>}, {transform_indices = @transform_5, window_bounds = array<i64: 1, 32, 128>}, {transform_indices = @transform_6, window_bounds = array<i64: 1, 1, 128>}, {transform_indices = @transform_7, window_bounds = array<i64: 1, 128, 32>}, {transform_indices = @transform_8, window_bounds = array<i64: 1, 8, 32>}, {transform_indices = @transform_9, window_bounds = array<i64: 1, 8, 32>}]} {
    %c0_i32 = arith.constant 0 : i32
    %0 = arith.cmpi eq, %arg1, %c0_i32 : i32
    %1 = arith.extui %0 : i1 to i32
    %c0_i32_0 = arith.constant 0 : i32
    %2 = arith.cmpi ne, %1, %c0_i32_0 : i32
    scf.if %2 {
      %c0_48 = arith.constant 0 : index
      %c0_49 = arith.constant 0 : index
      %c0_50 = arith.constant 0 : index
      %135 = vector.load %arg2[%c0_48, %c0_49, %c0_50] : memref<1x8x32xf32, #tpu.memory_space<vmem>>, vector<1x8x32xf32>
      %c0_51 = arith.constant 0 : index
      %c0_52 = arith.constant 0 : index
      %c0_53 = arith.constant 0 : index
      %136 = vector.load %arg11[%c0_51, %c0_52, %c0_53] : memref<1x8x32xf32, #tpu.memory_space<vmem>>, vector<1x8x32xf32>
      tpu.vector_store %arg11[%c0_51, %c0_52, %c0_53], %135 {strides = array<i32>} : memref<1x8x32xf32, #tpu.memory_space<vmem>>, vector<1x8x32xf32>,
    } else {
    }
    %c0 = arith.constant 0 : index
    %c0_1 = arith.constant 0 : index
    %c0_2 = arith.constant 0 : index
    %3 = vector.load %arg11[%c0, %c0_1, %c0_2] : memref<1x8x32xf32, #tpu.memory_space<vmem>>, vector<1x8x32xf32>
    %c0_3 = arith.constant 0 : index
    %c0_4 = arith.constant 0 : index
    %c0_5 = arith.constant 0 : index
    %4 = vector.load %arg10[%c0_3, %c0_4, %c0_5] : memref<1x8x32xf32, #tpu.memory_space<vmem>>, vector<1x8x32xf32>
    %5 = vector.shape_cast %4 : vector<1x8x32xf32> to vector<8x32xf32>
    %6 = vector.extract_strided_slice %5 {offsets = [0, 0], sizes = [1, 32], strides = [1, 1]} : vector<8x32xf32> to vector<1x32xf32>
    %7 = vector.extract_strided_slice %5 {offsets = [1, 0], sizes = [1, 32], strides = [1, 1]} : vector<8x32xf32> to vector<1x32xf32>
    %8 = vector.extract_strided_slice %5 {offsets = [2, 0], sizes = [1, 32], strides = [1, 1]} : vector<8x32xf32> to vector<1x32xf32>
    %9 = vector.extract_strided_slice %5 {offsets = [3, 0], sizes = [1, 32], strides = [1, 1]} : vector<8x32xf32> to vector<1x32xf32>
    %10 = vector.extract_strided_slice %5 {offsets = [4, 0], sizes = [1, 32], strides = [1, 1]} : vector<8x32xf32> to vector<1x32xf32>
    %11 = vector.extract_strided_slice %5 {offsets = [5, 0], sizes = [1, 32], strides = [1, 1]} : vector<8x32xf32> to vector<1x32xf32>
    %12 = vector.shape_cast %3 : vector<1x8x32xf32> to vector<8x32xf32>
    %13 = arith.truncf %12 : vector<8x32xf32> to vector<8x32xbf16>
    %c0_6 = arith.constant 0 : index
    %c0_7 = arith.constant 0 : index
    %c0_8 = arith.constant 0 : index
    %14 = vector.load %arg4[%c0_6, %c0_7, %c0_8] : memref<1x32x96xbf16, #tpu.memory_space<vmem>>, vector<1x32x96xbf16>
    %15 = vector.shape_cast %14 : vector<1x32x96xbf16> to vector<32x96xbf16>
    %cst = arith.constant dense<0.000000e+00> : vector<8x96xf32>
    %16 = tpu.matmul %13, %15, %cst {dimension_numbers = #tpu.dot_dimension_numbers<[1], [0], [0], [1], [0, 0, 1, 1], [], []>} : vector<8x32xbf16>, vector<32x96xbf16>, vector<8x96xf32> -> vector<8x96xf32>
    %c0_9 = arith.constant 0 : index
    %c0_10 = arith.constant 0 : index
    %c0_11 = arith.constant 0 : index
    %17 = vector.load %arg5[%c0_9, %c0_10, %c0_11] : memref<1x1x96xf32, #tpu.memory_space<vmem>>, vector<1x1x96xf32>
    %18 = vector.shape_cast %17 : vector<1x1x96xf32> to vector<1x96xf32>
    %19 = vector.broadcast %18 : vector<1x96xf32> to vector<8x96xf32>
    %20 = arith.addf %16, %19 : vector<8x96xf32>
    %21 = arith.truncf %20 : vector<8x96xf32> to vector<8x96xbf16>
    %22 = vector.extract_strided_slice %21 {offsets = [0, 0], sizes = [8, 32], strides = [1, 1]} : vector<8x96xbf16> to vector<8x32xbf16>
    %23 = vector.shape_cast %22 : vector<8x32xbf16> to vector<1x8x32xbf16>
    %24 = vector.extract_strided_slice %23 {offsets = [0, 0, 0], sizes = [1, 8, 8], strides = [1, 1, 1]} : vector<1x8x32xbf16> to vector<1x8x8xbf16>
    %25 = vector.extract_strided_slice %23 {offsets = [0, 0, 8], sizes = [1, 8, 8], strides = [1, 1, 1]} : vector<1x8x32xbf16> to vector<1x8x8xbf16>
    %26 = vector.extract_strided_slice %23 {offsets = [0, 0, 16], sizes = [1, 8, 8], strides = [1, 1, 1]} : vector<1x8x32xbf16> to vector<1x8x8xbf16>
    %27 = vector.extract_strided_slice %23 {offsets = [0, 0, 24], sizes = [1, 8, 8], strides = [1, 1, 1]} : vector<1x8x32xbf16> to vector<1x8x8xbf16>
    %28 = tpu.concatenate %24, %25, %26, %27 in 0 : vector<1x8x8xbf16>, vector<1x8x8xbf16>, vector<1x8x8xbf16>, vector<1x8x8xbf16> -> vector<4x8x8xbf16>
    %29 = vector.extract_strided_slice %21 {offsets = [0, 32], sizes = [8, 32], strides = [1, 1]} : vector<8x96xbf16> to vector<8x32xbf16>
    %30 = vector.shape_cast %29 : vector<8x32xbf16> to vector<1x8x32xbf16>
    %31 = vector.extract_strided_slice %30 {offsets = [0, 0, 0], sizes = [1, 8, 8], strides = [1, 1, 1]} : vector<1x8x32xbf16> to vector<1x8x8xbf16>
    %32 = vector.extract_strided_slice %30 {offsets = [0, 0, 8], sizes = [1, 8, 8], strides = [1, 1, 1]} : vector<1x8x32xbf16> to vector<1x8x8xbf16>
    %33 = vector.extract_strided_slice %30 {offsets = [0, 0, 16], sizes = [1, 8, 8], strides = [1, 1, 1]} : vector<1x8x32xbf16> to vector<1x8x8xbf16>
    %34 = vector.extract_strided_slice %30 {offsets = [0, 0, 24], sizes = [1, 8, 8], strides = [1, 1, 1]} : vector<1x8x32xbf16> to vector<1x8x8xbf16>
    %35 = tpu.concatenate %31, %32, %33, %34 in 0 : vector<1x8x8xbf16>, vector<1x8x8xbf16>, vector<1x8x8xbf16>, vector<1x8x8xbf16> -> vector<4x8x8xbf16>
    %36 = vector.extract_strided_slice %21 {offsets = [0, 64], sizes = [8, 32], strides = [1, 1]} : vector<8x96xbf16> to vector<8x32xbf16>
    %37 = vector.shape_cast %36 : vector<8x32xbf16> to vector<1x8x32xbf16>
    %38 = vector.extract_strided_slice %37 {offsets = [0, 0, 0], sizes = [1, 8, 8], strides = [1, 1, 1]} : vector<1x8x32xbf16> to vector<1x8x8xbf16>
    %39 = vector.extract_strided_slice %37 {offsets = [0, 0, 8], sizes = [1, 8, 8], strides = [1, 1, 1]} : vector<1x8x32xbf16> to vector<1x8x8xbf16>
    %40 = vector.extract_strided_slice %37 {offsets = [0, 0, 16], sizes = [1, 8, 8], strides = [1, 1, 1]} : vector<1x8x32xbf16> to vector<1x8x8xbf16>
    %41 = vector.extract_strided_slice %37 {offsets = [0, 0, 24], sizes = [1, 8, 8], strides = [1, 1, 1]} : vector<1x8x32xbf16> to vector<1x8x8xbf16>
    %42 = tpu.concatenate %38, %39, %40, %41 in 0 : vector<1x8x8xbf16>, vector<1x8x8xbf16>, vector<1x8x8xbf16>, vector<1x8x8xbf16> -> vector<4x8x8xbf16>
    "tpu.trace_start"() <{level = 10 : i32, message = "bqd,bkd->bqk"}> : () -> ()
    %cst_12 = arith.constant dense<0.000000e+00> : vector<4x8x8xf32>
    %43 = tpu.matmul %28, %35, %cst_12 {dimension_numbers = #tpu.dot_dimension_numbers<[2], [2], [1], [1], [0, 0, 0, 1, 1, 1], [0], [0]>} : vector<4x8x8xbf16>, vector<4x8x8xbf16>, vector<4x8x8xf32> -> vector<4x8x8xf32>
    "tpu.trace_stop"() : () -> ()
    %c0_13 = arith.constant 0 : index
    %c0_14 = arith.constant 0 : index
    %c0_15 = arith.constant 0 : index
    %44 = vector.load %arg3[%c0_13, %c0_14, %c0_15] : memref<1x1x8xf32, #tpu.memory_space<vmem>>, vector<1x1x8xf32>
    %45 = vector.shape_cast %44 : vector<1x1x8xf32> to vector<1x1x1x8xf32>
    %46 = vector.shape_cast %45 : vector<1x1x1x8xf32> to vector<1x1x1x8xf32>
    %47 = vector.broadcast %46 : vector<1x1x1x8xf32> to vector<4x1x1x8xf32>
    %48 = vector.shape_cast %47 : vector<4x1x1x8xf32> to vector<4x1x8xf32>
    %49 = vector.broadcast %48 : vector<4x1x8xf32> to vector<4x8x8xf32>
    %50 = arith.addf %43, %49 : vector<4x8x8xf32>
    %cst_16 = arith.constant dense<0xFF800000> : vector<4x8xf32>
    %51 = vector.multi_reduction <maximumf>, %50, %cst_16 [2] : vector<4x8x8xf32> to vector<4x8xf32>
    %52 = vector.shape_cast %51 : vector<4x8xf32> to vector<4x8x1xf32>
    %53 = vector.broadcast %52 : vector<4x8x1xf32> to vector<4x8x8xf32>
    %54 = arith.subf %50, %53 : vector<4x8x8xf32>
    %55 = math.exp %54 : vector<4x8x8xf32>
    %cst_17 = arith.constant dense<0.000000e+00> : vector<4x8xf32>
    %56 = vector.multi_reduction <add>, %55, %cst_17 [2] : vector<4x8x8xf32> to vector<4x8xf32>
    %57 = vector.shape_cast %56 : vector<4x8xf32> to vector<4x8x1xf32>
    %58 = tpu.reciprocal %57 {approx = true} : vector<4x8x1xf32> -> vector<4x8x1xf32>
    %59 = vector.broadcast %58 : vector<4x8x1xf32> to vector<4x8x8xf32>
    %60 = arith.mulf %55, %59 : vector<4x8x8xf32>
    %61 = arith.truncf %60 : vector<4x8x8xf32> to vector<4x8x8xbf16>
    "tpu.trace_start"() <{level = 10 : i32, message = "bqk,bkd->bqd"}> : () -> ()
    %cst_18 = arith.constant dense<0.000000e+00> : vector<4x8x8xf32>
    %62 = tpu.matmul %61, %42, %cst_18 {dimension_numbers = #tpu.dot_dimension_numbers<[2], [1], [1], [2], [0, 0, 0, 1, 1, 2], [0], [0]>} : vector<4x8x8xbf16>, vector<4x8x8xbf16>, vector<4x8x8xf32> -> vector<4x8x8xf32>
    "tpu.trace_stop"() : () -> ()
    %63 = arith.truncf %62 : vector<4x8x8xf32> to vector<4x8x8xbf16>
    %64 = vector.extract_strided_slice %63 {offsets = [0, 0, 0], sizes = [1, 8, 8], strides = [1, 1, 1]} : vector<4x8x8xbf16> to vector<1x8x8xbf16>
    %65 = vector.extract_strided_slice %63 {offsets = [1, 0, 0], sizes = [1, 8, 8], strides = [1, 1, 1]} : vector<4x8x8xbf16> to vector<1x8x8xbf16>
    %66 = vector.extract_strided_slice %63 {offsets = [2, 0, 0], sizes = [1, 8, 8], strides = [1, 1, 1]} : vector<4x8x8xbf16> to vector<1x8x8xbf16>
    %67 = vector.extract_strided_slice %63 {offsets = [3, 0, 0], sizes = [1, 8, 8], strides = [1, 1, 1]} : vector<4x8x8xbf16> to vector<1x8x8xbf16>
    %68 = tpu.concatenate %64, %65, %66, %67 in 2 : vector<1x8x8xbf16>, vector<1x8x8xbf16>, vector<1x8x8xbf16>, vector<1x8x8xbf16> -> vector<1x8x32xbf16>
    %69 = vector.shape_cast %68 : vector<1x8x32xbf16> to vector<8x32xbf16>
    %c0_19 = arith.constant 0 : index
    %c0_20 = arith.constant 0 : index
    %c0_21 = arith.constant 0 : index
    %70 = vector.load %arg6[%c0_19, %c0_20, %c0_21] : memref<1x32x32xbf16, #tpu.memory_space<vmem>>, vector<1x32x32xbf16>
    %71 = vector.shape_cast %70 : vector<1x32x32xbf16> to vector<32x32xbf16>
    %cst_22 = arith.constant dense<0.000000e+00> : vector<8x32xf32>
    %72 = tpu.matmul %69, %71, %cst_22 {dimension_numbers = #tpu.dot_dimension_numbers<[1], [0], [0], [1], [0, 0, 1, 1], [], []>} : vector<8x32xbf16>, vector<32x32xbf16>, vector<8x32xf32> -> vector<8x32xf32>
    %73 = vector.broadcast %6 : vector<1x32xf32> to vector<8x32xf32>
    %74 = arith.addf %72, %73 : vector<8x32xf32>
    %75 = arith.addf %12, %74 : vector<8x32xf32>
    %cst_23 = arith.constant dense<0.000000e+00> : vector<8xf32>
    %76 = vector.multi_reduction <add>, %75, %cst_23 [1] : vector<8x32xf32> to vector<8xf32>
    %77 = vector.shape_cast %76 : vector<8xf32> to vector<8x1xf32>
    %cst_24 = arith.constant 3.200000e+01 : f32
    %78 = vector.broadcast %cst_24 : f32 to vector<8x1xf32>
    %79 = arith.divf %77, %78 : vector<8x1xf32>
    %80 = vector.broadcast %79 : vector<8x1xf32> to vector<8x32xf32>
    %81 = arith.subf %75, %80 : vector<8x32xf32>
    %82 = arith.mulf %81, %81 : vector<8x32xf32>
    %cst_25 = arith.constant dense<0.000000e+00> : vector<8xf32>
    %83 = vector.multi_reduction <add>, %82, %cst_25 [1] : vector<8x32xf32> to vector<8xf32>
    %84 = vector.shape_cast %83 : vector<8xf32> to vector<8x1xf32>
    %cst_26 = arith.constant 3.200000e+01 : f32
    %85 = vector.broadcast %cst_26 : f32 to vector<8x1xf32>
    %86 = arith.divf %84, %85 : vector<8x1xf32>
    %cst_27 = arith.constant 9.99999974E-6 : f32
    %87 = vector.broadcast %cst_27 : f32 to vector<8x1xf32>
    %88 = arith.addf %86, %87 : vector<8x1xf32>
    %89 = math.rsqrt %88 : vector<8x1xf32>
    %90 = vector.broadcast %89 : vector<8x1xf32> to vector<8x32xf32>
    %91 = arith.mulf %81, %90 : vector<8x32xf32>
    %92 = vector.broadcast %7 : vector<1x32xf32> to vector<8x32xf32>
    %93 = arith.mulf %91, %92 : vector<8x32xf32>
    %94 = vector.broadcast %8 : vector<1x32xf32> to vector<8x32xf32>
    %95 = arith.addf %93, %94 : vector<8x32xf32>
    %96 = arith.truncf %95 : vector<8x32xf32> to vector<8x32xbf16>
    %c0_28 = arith.constant 0 : index
    %c0_29 = arith.constant 0 : index
    %c0_30 = arith.constant 0 : index
    %97 = vector.load %arg7[%c0_28, %c0_29, %c0_30] : memref<1x32x128xbf16, #tpu.memory_space<vmem>>, vector<1x32x128xbf16>
    %98 = vector.shape_cast %97 : vector<1x32x128xbf16> to vector<32x128xbf16>
    %cst_31 = arith.constant dense<0.000000e+00> : vector<8x128xf32>
    %99 = tpu.matmul %96, %98, %cst_31 {dimension_numbers = #tpu.dot_dimension_numbers<[1], [0], [0], [1], [0, 0, 1, 1], [], []>} : vector<8x32xbf16>, vector<32x128xbf16>, vector<8x128xf32> -> vector<8x128xf32>
    %c0_32 = arith.constant 0 : index
    %c0_33 = arith.constant 0 : index
    %c0_34 = arith.constant 0 : index
    %100 = vector.load %arg8[%c0_32, %c0_33, %c0_34] : memref<1x1x128xf32, #tpu.memory_space<vmem>>, vector<1x1x128xf32>
    %101 = vector.shape_cast %100 : vector<1x1x128xf32> to vector<1x128xf32>
    %102 = vector.broadcast %101 : vector<1x128xf32> to vector<8x128xf32>
    %103 = arith.addf %99, %102 : vector<8x128xf32>
    %cst_35 = arith.constant 0.000000e+00 : f32
    %104 = vector.broadcast %cst_35 : f32 to vector<8x128xf32>
    %105 = arith.maximumf %103, %104 : vector<8x128xf32>
    %106 = arith.truncf %105 : vector<8x128xf32> to vector<8x128xbf16>
    %c0_36 = arith.constant 0 : index
    %c0_37 = arith.constant 0 : index
    %c0_38 = arith.constant 0 : index
    %107 = vector.load %arg9[%c0_36, %c0_37, %c0_38] : memref<1x128x32xbf16, #tpu.memory_space<vmem>>, vector<1x128x32xbf16>
    %108 = vector.shape_cast %107 : vector<1x128x32xbf16> to vector<128x32xbf16>
    %cst_39 = arith.constant dense<0.000000e+00> : vector<8x32xf32>
    %109 = tpu.matmul %106, %108, %cst_39 {dimension_numbers = #tpu.dot_dimension_numbers<[1], [0], [0], [1], [0, 0, 1, 1], [], []>} : vector<8x128xbf16>, vector<128x32xbf16>, vector<8x32xf32> -> vector<8x32xf32>
    %110 = vector.broadcast %9 : vector<1x32xf32> to vector<8x32xf32>
    %111 = arith.addf %109, %110 : vector<8x32xf32>
    %112 = arith.addf %95, %111 : vector<8x32xf32>
    %cst_40 = arith.constant dense<0.000000e+00> : vector<8xf32>
    %113 = vector.multi_reduction <add>, %112, %cst_40 [1] : vector<8x32xf32> to vector<8xf32>
    %114 = vector.shape_cast %113 : vector<8xf32> to vector<8x1xf32>
    %cst_41 = arith.constant 3.200000e+01 : f32
    %115 = vector.broadcast %cst_41 : f32 to vector<8x1xf32>
    %116 = arith.divf %114, %115 : vector<8x1xf32>
    %117 = vector.broadcast %116 : vector<8x1xf32> to vector<8x32xf32>
    %118 = arith.subf %112, %117 : vector<8x32xf32>
    %119 = arith.mulf %118, %118 : vector<8x32xf32>
    %cst_42 = arith.constant dense<0.000000e+00> : vector<8xf32>
    %120 = vector.multi_reduction <add>, %119, %cst_42 [1] : vector<8x32xf32> to vector<8xf32>
    %121 = vector.shape_cast %120 : vector<8xf32> to vector<8x1xf32>
    %cst_43 = arith.constant 3.200000e+01 : f32
    %122 = vector.broadcast %cst_43 : f32 to vector<8x1xf32>
    %123 = arith.divf %121, %122 : vector<8x1xf32>
    %cst_44 = arith.constant 9.99999974E-6 : f32
    %124 = vector.broadcast %cst_44 : f32 to vector<8x1xf32>
    %125 = arith.addf %123, %124 : vector<8x1xf32>
    %126 = math.rsqrt %125 : vector<8x1xf32>
    %127 = vector.broadcast %126 : vector<8x1xf32> to vector<8x32xf32>
    %128 = arith.mulf %118, %127 : vector<8x32xf32>
    %129 = vector.broadcast %10 : vector<1x32xf32> to vector<8x32xf32>
    %130 = arith.mulf %128, %129 : vector<8x32xf32>
    %131 = vector.broadcast %11 : vector<1x32xf32> to vector<8x32xf32>
    %132 = arith.addf %130, %131 : vector<8x32xf32>
    %133 = vector.shape_cast %132 : vector<8x32xf32> to vector<1x8x32xf32>
    %c0_45 = arith.constant 0 : index
    %c0_46 = arith.constant 0 : index
    %c0_47 = arith.constant 0 : index
    %134 = vector.load %arg11[%c0_45, %c0_46, %c0_47] : memref<1x8x32xf32, #tpu.memory_space<vmem>>, vector<1x8x32xf32>
    tpu.vector_store %arg11[%c0_45, %c0_46, %c0_47], %133 {strides = array<i32>} : memref<1x8x32xf32, #tpu.memory_space<vmem>>, vector<1x8x32xf32>,
    return
  }
  func.func @transform_0(%arg0: i32, %arg1: i32) -> (i32, i32, i32) {
    %c0_i32 = arith.constant 0 : i32
    %c0_i32_0 = arith.constant 0 : i32
    %c0_i32_1 = arith.constant 0 : i32
    return %arg0, %c0_i32, %c0_i32_0 : i32, i32, i32
  }
  func.func @transform_1(%arg0: i32, %arg1: i32) -> (i32, i32, i32) {
    %c0_i32 = arith.constant 0 : i32
    %c0_i32_0 = arith.constant 0 : i32
    %c0_i32_1 = arith.constant 0 : i32
    return %arg0, %c0_i32, %c0_i32_0 : i32, i32, i32
  }
  func.func @transform_2(%arg0: i32, %arg1: i32) -> (i32, i32, i32) {
    %c0_i32 = arith.constant 0 : i32
    %c0_i32_0 = arith.constant 0 : i32
    %c0_i32_1 = arith.constant 0 : i32
    return %arg1, %c0_i32, %c0_i32_0 : i32, i32, i32
  }
  func.func @transform_3(%arg0: i32, %arg1: i32) -> (i32, i32, i32) {
    %c0_i32 = arith.constant 0 : i32
    %c0_i32_0 = arith.constant 0 : i32
    %c0_i32_1 = arith.constant 0 : i32
    return %arg1, %c0_i32, %c0_i32_0 : i32, i32, i32
  }
  func.func @transform_4(%arg0: i32, %arg1: i32) -> (i32, i32, i32) {
    %c0_i32 = arith.constant 0 : i32
    %c0_i32_0 = arith.constant 0 : i32
    %c0_i32_1 = arith.constant 0 : i32
    return %arg1, %c0_i32, %c0_i32_0 : i32, i32, i32
  }
  func.func @transform_5(%arg0: i32, %arg1: i32) -> (i32, i32, i32) {
    %c0_i32 = arith.constant 0 : i32
    %c0_i32_0 = arith.constant 0 : i32
    %c0_i32_1 = arith.constant 0 : i32
    return %arg1, %c0_i32, %c0_i32_0 : i32, i32, i32
  }
  func.func @transform_6(%arg0: i32, %arg1: i32) -> (i32, i32, i32) {
    %c0_i32 = arith.constant 0 : i32
    %c0_i32_0 = arith.constant 0 : i32
    %c0_i32_1 = arith.constant 0 : i32
    return %arg1, %c0_i32, %c0_i32_0 : i32, i32, i32
  }
  func.func @transform_7(%arg0: i32, %arg1: i32) -> (i32, i32, i32) {
    %c0_i32 = arith.constant 0 : i32
    %c0_i32_0 = arith.constant 0 : i32
    %c0_i32_1 = arith.constant 0 : i32
    return %arg1, %c0_i32, %c0_i32_0 : i32, i32, i32
  }
  func.func @transform_8(%arg0: i32, %arg1: i32) -> (i32, i32, i32) {
    %c0_i32 = arith.constant 0 : i32
    %c0_i32_0 = arith.constant 0 : i32
    %c0_i32_1 = arith.constant 0 : i32
    return %arg1, %c0_i32, %c0_i32_0 : i32, i32, i32
  }
  func.func @transform_9(%arg0: i32, %arg1: i32) -> (i32, i32, i32) {
    %c0_i32 = arith.constant 0 : i32
    %c0_i32_0 = arith.constant 0 : i32
    %c0_i32_1 = arith.constant 0 : i32
    return %arg0, %c0_i32, %c0_i32_0 : i32, i32, i32
  }
}

</mosaic_0001>

<bundles_post_ra>
// kernel: tpu_custom_call.1
= control target key start
LH: loop header
LB: loop body
LE: loop exit
PB: predicated region body
PF: predicated region fallthrough
CT: control target
= control target key end

     0   :  { %s2262_s0 = inlined_call_operand.vmem [shape: f32[2,8,32], index: 0, kind: input, shape index: {}]   ;;  %s2263_s1 = inlined_call_operand.vmem [shape: f32[2,1,8], index: 1, kind: input, shape index: {}]   ;;  %s2264_s2 = inlined_call_operand.vmem [shape: bf16[2,32,96], index: 2, kind: input, shape index: {}]   ;;  %s2265_s3 = inlined_call_operand.vmem [shape: f32[2,1,96], index: 3, kind: input, shape index: {}]   ;;  %s2266_s4 = inlined_call_operand.vmem [shape: bf16[2,32,32], index: 4, kind: input, shape index: {}]   ;;  %s2267_s5 = inlined_call_operand.vmem [shape: bf16[2,32,128], index: 5, kind: input, shape index: {}]   ;;  %s2268_s6 = inlined_call_operand.vmem [shape: f32[2,1,128], index: 6, kind: input, shape index: {}]   ;;  %s2269_s7 = inlined_call_operand.vmem [shape: bf16[2,128,32], index: 7, kind: input, shape index: {}]   ;;  %s2270_s8 = inlined_call_operand.vmem [shape: f32[2,8,32], index: 8, kind: input, shape index: {}]   ;;  %s2271_s9 = inlined_call_operand.hbm [shape: f32[2,8,32], index: 9, kind: output, shape index: {}]  }
   0x1   :  { %2285 = sst [smem:[#allocation16_spill]] %s2262_s0 }
   0x2   :  { %2286 = sst [smem:[#allocation17_spill]] %s2264_s2 }
   0x3   :  { %2287 = sst [smem:[#allocation18_spill]] %s2271_s9 }
   0x4   :  { %14 = vsyncpa [#allocation3], 0 }
   0x5   :  { %16 = vsyncpa [#allocation3 + $0x1], 0  ;;  %s1937_s30 = smov 0   ;;  %s1939_s10 = smov 0  }
   0x6   :  { %s1941_s11 = smov 0   ;;  %s1943_s12 = smov 0  }
   0x7   :  { %s1945_s13 = smov 0   ;;  %s1947_s14 = smov 0  }
   0x8   :  { %s1949_s15 = smov 0   ;;  %s1951_s16 = smov 0  }
   0x9 LB: > { %2288 = sst [smem:[#allocation5_spill]] %s1846_s30  ;;  %s1488_s17 = sadd.s32 4294967295, %s1874_s16   ;;  %s1874_s16 = sphi %s1951_s16, %s22_s16   ;;  %s1870_s15 = sphi %s1949_s15, %s2318_s15   ;;  %s1866_s14 = sphi %s1947_s14, %s2317_s14   ;;  %s1862_s13 = sphi %s1945_s13, %s2316_s13   ;;  %s1858_s12 = sphi %s1943_s12, %s2315_s12   ;;  %s1854_s11 = sphi %s1941_s11, %s2314_s11   ;;  %s1850_s10 = sphi %s1939_s10, %s2313_s10   ;;  %s1846_s30 = sphi %s1937_s30, %s2312_s30  }
   0xa   : > { %2289 = sst [smem:[#allocation6_spill]] %s1850_s10  ;;  %s1489_s18 = sadd.s32 4294967294, %s1874_s16  }
   0xb   : > { %2290 = sst [smem:[#allocation7_spill]] %s1854_s11  ;;  %s31_s19 = sadd.s32 1, %s1866_s14 }
   0xc   : > { %2291 = sst [smem:[#allocation8_spill]] %s1866_s14  ;;  %p32_p0 = scmp.ge.s32.totalorder %s31_s19, 2 }
   0xd   : > { %2292 = sst [smem:[#allocation9_spill]] %s1870_s15  ;;  %s34_s20 = sadd.s32 1, %s1870_s15 }
   0xe   : > { %2293 = sst [smem:[#allocation10_spill]] %s1874_s16  ;;  %p285_p1 = scmp.ne.s32.totalorder %s1854_s11, %s1850_s10 }
   0xf   : > { %p286_p2 = scmp.eq.s32.totalorder %s1488_s17, 3  ;;  %s2320_s19 = smov (%p32_p0, %s31_s19), 0 }
  0x10   : > { %2294 = sst [smem:[#allocation11_spill]] %s2320_s19  ;;  %s2322_s20 = smov (!%p32_p0, %s34_s20), %s1870_s15 }
  0x11   : > { %p1986_p3 = por %p286_p2, %p285_p1  ;;  %p291_p4 = scmp.ne.s32.totalorder %s1850_s10, %s1846_s30 }
  0x12   : > { %p36_p5 = scmp.ge.s32.totalorder %s2322_s20, 2  ;;  %p292_p6 = scmp.eq.s32.totalorder %s1489_s18, 3 }
  0x13   : > { %s2295_s21 = scalar_select %p1986_p3, 1, 0 }
  0x14   : > { %p1492_p7 = scmp.ge.s32.totalorder %s1874_s16, 1  ;;  %p374_p8 = scmp.lt.s32.totalorder %s1874_s16, 5 }
  0x15   : > { %2296 = sst [smem:[#allocation12_spill]] %s2295_s21  ;;  %s2324_s20 = smov (%p36_p5, %s2322_s20), 0 }
  0x16   : > { %2297 = sst [smem:[#allocation13_spill]] %s2324_s20  ;;  %p1996_p9 = por %p292_p6, %p291_p4 }
  0x17   : > { %p375_p10 = pnand %p1492_p7, %p374_p8  ;;  %s272_s23 = ssub.s32 %s1870_s15, %s2324_s20 }
  0x18   : > { %s2298_s22 = scalar_select %p1996_p9, 1, 0 }
  0x19   : > { %s275_s24 = sadd.s32 1, %s1854_s11  ;;  %p273_p11 = scmp.eq.s32.totalorder %s272_s23, 0 }
  0x1a   : > { %2299 = sst [smem:[#allocation14_spill]] %s2298_s22  ;;  %378 = sbr.rel (%p375_p10) target bundleno = 2543 (0x9ef), region = 56 }
  0x1b   : > { %s2004_s25 = scalar_select %p273_p11, %s1854_s11, %s275_s24  }
  0x1c   : > { %s2273_s26 = sand.u32 (!%p375_p10), 1, %s1850_s10   ;;  %p442_p12 = scmp.lt.s32.totalorder (!%p375_p10), %s1862_s13, 1 }
  0x1d   : > { %2300 = sst [smem:[#allocation15_spill]] %s2004_s25  ;;  %s1493_s27 = sshll.u32 (!%p375_p10), %s2273_s26, 3 }
  0x1e   : > { %p449_p13 = scmp.lt.s32.totalorder (!%p375_p10), %s1858_s12, 1  ;;  %s2301_s0 = sld [smem:[#allocation16_spill]] (!%p375_p10) }
  0x1f   : > { %s2012_s28 = scalar_select %p442_p12, %s1862_s13, 1 }
  0x20   : > { %s2015_s29 = scalar_select %p449_p13, %s1858_s12, 1 }
  0x21   : > { %s1494_s17 = sshll.u32 %s2012_s28, 3  ;;  %s2302_s2 = sld [smem:[#allocation17_spill]] }
  0x22   : > { %s1537_s15 = sshll.u32 %s2015_s29, 4  ;;  %s1540_s14 = sshll.u32 %s2015_s29, 6 }
  0x23   : > { %s2036_s10 = scalar_lea.vmem %s2266_s4, %s1537_s15  ;;  %s2041_s24 = scalar_lea.vmem %s2267_s5, %s1537_s15 }
  0x24   : > { %s445_s26 = scalar_lea.vmem %s2301_s0, %s1494_s17  ;;  %s469_s17 = scalar_lea.vmem %s2268_s6, %s2015_s29 }
  0x25   : > { %s2051_s30 = scalar_lea.vmem %s2269_s7, %s1540_s14  ;;  %s1503_s22 = sshll.u32 %s2015_s29, 3 }
  0x26   : > { %s2057_s21 = scalar_lea.vmem %s2270_s8, %s1503_s22  ;;  %p1504_p0 = scmp.ne.s32.totalorder %s1858_s12, 0 }
  0x27   : > { %s453_s11 = scalar_lea.vmem %s2302_s2, %s1537_s15  ;;  %s2059_s2 = scalar_lea.vmem [#allocation2], %s1493_s27 }
  0x28   : > { %483 = sbr.rel (%p1504_p0) target bundleno = 47 (0x2f), region = 60 }
  0x2d   : > { %v484_v0 = vld [vmem:[%s445_s26] sm:$0xff]  ;;  %vm485_vm0 = vcmask 261120  }
  0x2e   : > { %486 = vst.msk [vmem:[%s2059_s2] sm:$0xff] %vm485_vm0, %v484_v0 }
  0x2f PF: > { %v1748_v1 = vld [vmem:[%s453_s11 + $0x8] sm:$0xff]   ;;  %v1876_v2 = vmov 0.0   ;;  %v1749_v3 = vld [vmem:[%s453_s11] sm:$0xff]   ;;  %vm1877_vm1 = vmmov 0   ;;  %vm513_vm2 = vcmask 261120   ;;  %s2303_s12 = scalar_lea.vmem %s2265_s3, %s2015_s29  ;;  %s1878_s15 = smov 104  }
  0x30   : > { %1575 = vmatprep.subr.bf16.mxu0 %v1876_v2  ;;  %1595 = vmatprep.subr.bf16.mxu1 %v1876_v2  ;;  %v1505_v6 = vld [vmem:[%s2303_s12] ss:$0 sm:$0xff]  ;;  %s1879_s16 = smov 120   ;;  %s1880_s26 = smov 96   ;;  %vm574_vm3 = vcmask 64512   ;;  %vm818_vm4 = vcmask 1043456  }
  0x31   : > { %1576 = vmatpush3.bf16.msra.mxu0 %v1748_v1  ;;  %1579 = vmatprep.mubr.msk.bf16.mxu0 %vm1877_vm1, %v1876_v2  ;;  %s1881_s27 = smov 112   ;;  %s2304_s19 = scalar_lea.vmem %s2263_s1, %s2012_s28  ;;  %vm1022_vm5 = vcmask 130048   ;;  %vm1025_vm6 = vcmask 195584  }
  0x32   : > { %1577 = vmatprep.subr.bf16.mxu0 %v1876_v2  ;;  %1597 = vmatprep.mubr.msk.bf16.mxu1 %vm1877_vm1, %v1876_v2  ;;  %v1509_v24 = vld [vmem:[%s2304_s19] ss:$0 sm:$0xff]  ;;  %s1882_s28 = smov 64   ;;  %s1883_s20 = smov 8  }
  0x33   : > { %s1884_s14 = smov 16   ;;  %s2305_s29 = sld [smem:[#allocation6_spill]] }
  0x34   : > { %s1331_s22 = sshll.u32 %s2059_s2, 4  ;;  %s2307_s0 = sld [smem:[#allocation18_spill]]  ;;  %s1332_s22 = int_to_ptr.vmem [resolvable:$true] %s1331_s22 }
  0x35   : > { %v2068_v4 = vld [vmem:[%s2059_s2] sm:$0xff]  ;;  %1578 = vmatpush3.bf16.msra.mxu0 %v1749_v3 }
  0x36   : > { %v489_v5 = vpack.c.bf16 %v2068_v4, %v2068_v4  ;;  %1583 = vmatprep.subr.bf16.mxu0 %v1876_v2 }
  0x38   : > { %1580 = vmatmul.mubr.msk.bf16.vlgmr.msra.gmra.mxu0 %vm513_vm2, %v489_v5 }
  0x39   : > { %1585 = vmatprep.mubr.msk.bf16.mxu0 %vm1877_vm1, %v1876_v2  ;;  %s2308_s12 = sand.u32 1, %s2305_s29  }
  0xf8   : > { %v551_v7 = vpop.f32.mrf.mxu0 }
  0xf9   : > { %v552_v8 = vadd.f32 %v1505_v6, %v551_v7 }
  0xfa   : > { %v1581_v9 = vpop.f32.mrf.mxu0 }
  0xfb   : > { %v2084_v10 = vpack.c.bf16 %v552_v8, %v552_v8 }
  0xfc   : > { %v554_v11 = vpop.f32.mrf.mxu0 }
  0xfd   : > { %563 = vrot.lane.b32.xlu1 %v2084_v10, %s1878_s15  ;;  %559 = vrot.lane.b32.xlu0 %v2084_v10, %s1879_s16  ;;  %s1318_s15 = scalar_lea.sflag [#allocation3], %s2308_s12  ;;  %s1782_s16 = scalar_lea.vmem %s1332_s22, 128 }
  0xfe   : > { %v1582_v12 = vpop.f32.mrf.mxu0  ;;  %p1783_p1 = scmp.ne.s32.totalorder %s1332_s22, %s1782_s16 }
 0x100   : > { %p1784_p2 = pnand %p1783_p1, %p1986_p3 }
 0x101   : > { %572 = vrot.lane.b32.xlu1 %v2084_v10, %s1880_s26  ;;  %561 = vrot.lane.b32.xlu0 %v2084_v10, %s1881_s27 }
 0x102   : > { %p1785_p4 = pneg %p1784_p2 }
 0x16f   : > { %v2090_v13 = vpop.permute.xlu1 %563  ;;  %v560_v14 = vpop.permute.xlu0 %559 }
 0x170   : > { %621 = vrot.lane.b32.xlu0 %v560_v14, %s1880_s26 }
 0x173   : > { %v573_v15 = vpop.permute.xlu1 %572  ;;  %v2092_v16 = vpop.permute.xlu0 %561 }
 0x174   : > { %v579_v17 = vsel %vm574_vm3, %v573_v15, 0  ;;  %717 = vrot.lane.b32.xlu0 %v2090_v13, %s1880_s26  ;;  %669 = vrot.lane.b32.xlu1 %v2092_v16, %s1880_s26  ;;  %s1886_s26 = smov [#allocation2]  }
 0x175   : > { %1584 = vmatpush3.bf16.xpose.msra.mxu0 %v579_v17  ;;  %s1786_s27 = sshll.u32 %s1886_s26, 4  ;;  %s1787_s27 = int_to_ptr.vmem [resolvable:$false] %s1786_s27 }
 0x176   : > { %1589 = vmatprep.subr.bf16.mxu0 %v1876_v2  ;;  %p1789_p5 = scmp.lt.s32.totalorder %s1332_s22, %s1787_s27 }
 0x17c   : > { %1586 = vmatmul.mubr.msk.bf16.vlgmr.msra.gmra.mxu0 %vm574_vm3, %v2084_v10 }
 0x17d   : > { %1591 = vmatprep.mubr.msk.bf16.mxu0 %vm1877_vm1, %v1876_v2 }
 0x1e2   : > { %v622_v18 = vpop.permute.xlu0 %621 }
 0x1e3   : > { %v627_v19 = vsel %vm574_vm3, %v622_v18, 0 }
 0x1e4   : > { %1590 = vmatpush3.bf16.xpose.msra.mxu0 %v627_v19 }
 0x1e5   : > { %1601 = vmatprep.subr.bf16.mxu0 %v1876_v2 }
 0x1e6   : > { %v670_v20 = vpop.permute.xlu1 %669  ;;  %v718_v22 = vpop.permute.xlu0 %717 }
 0x1e7   : > { %v675_v21 = vsel %vm574_vm3, %v670_v20, 0  ;;  %v723_v23 = vsel %vm574_vm3, %v718_v22, 0 }
 0x1e8   : > { %1596 = vmatpush3.bf16.xpose.msra.mxu1 %v675_v21 }
 0x1e9   : > { %1607 = vmatprep.subr.bf16.mxu1 %v1876_v2 }
 0x1eb   : > { %1592 = vmatmul.mubr.msk.bf16.vlgmr.msra.gmra.mxu0 %vm574_vm3, %v560_v14 }
 0x1ec   : > { %1602 = vmatpush3.bf16.xpose.msra.mxu0 %v723_v23  ;;  %1603 = vmatprep.mubr.msk.bf16.mxu0 %vm1877_vm1, %v1876_v2 }
 0x1ed   : > { %1613 = vmatprep.subr.bf16.mxu0 %v1876_v2 }
 0x1ef   : > { %1598 = vmatmul.mubr.msk.bf16.vlgmr.msra.gmra.mxu1 %vm574_vm3, %v2092_v16 }
 0x1f0   : > { %1609 = vmatprep.mubr.msk.bf16.mxu1 %vm1877_vm1, %v1876_v2 }
 0x1f3   : > { %1604 = vmatmul.mubr.msk.bf16.vlgmr.msra.gmra.mxu0 %vm574_vm3, %v2090_v13 }
 0x1f4   : > { %1615 = vmatprep.mubr.msk.bf16.mxu0 %vm1877_vm1, %v1876_v2 }
 0x23c   : > { %v615_v25 = vpop.f32.mrf.mxu0 }
 0x23d   : > { %v616_v26 = vadd.f32 %v1509_v24, %v615_v25 }
 0x23e   : > { %v1587_v27 = vpop.f32.mrf.mxu0 }
 0x23f   : > { %v765_v28 = vsel %vm574_vm3, %v616_v26, -inf }
 0x240   : > { %766 = vmax.xlane.f32.xlu1 %v765_v28  ;;  %v618_v29 = vpop.f32.mrf.mxu0 }
 0x242   : > { %v1588_v30 = vpop.f32.mrf.mxu0 }
 0x2ab   : > { %v663_v31 = vpop.f32.mrf.mxu0 }
 0x2ac   : > { %v664_v32 = vadd.f32 %v1509_v24, %v663_v31 }
 0x2ad   : > { %v1593_v33 = vpop.f32.mrf.mxu0 }
 0x2ae   : > { %v768_v34 = vsel %vm574_vm3, %v664_v32, -inf }
 0x2af   : > { %v711_v35 = vpop.f32.mrf.mxu1  ;;  %769 = vmax.xlane.f32.xlu0 %v768_v34  ;;  %v666_v36 = vpop.f32.mrf.mxu0 }
 0x2b0   : > { %v712_v37 = vadd.f32 %v1509_v24, %v711_v35  ;;  %v1750_v35 = vld [vmem:[%s2036_s10 + $0x8] sm:$0xff]   ;;  %v1751_v36 = vld [vmem:[%s2036_s10] sm:$0xff]   ;;  %s1885_s10 = smov 24  }
 0x2b1   : > { %v1594_v38 = vpop.f32.mrf.mxu0  ;;  %v1599_v39 = vpop.f32.mrf.mxu1 }
 0x2b2   : > { %v771_v40 = vsel %vm574_vm3, %v712_v37, -inf }
 0x2b3   : > { %v714_v41 = vpop.f32.mrf.mxu1  ;;  %772 = vmax.xlane.f32.xlu0 %v771_v40  ;;  %v759_v42 = vpop.f32.mrf.mxu0 }
 0x2b4   : > { %v760_v43 = vadd.f32 %v1509_v24, %v759_v42 }
 0x2b5   : > { %v1600_v44 = vpop.f32.mrf.mxu1  ;;  %v1605_v45 = vpop.f32.mrf.mxu0 }
 0x2b6   : > { %v774_v46 = vsel %vm574_vm3, %v760_v43, -inf }
 0x2b7   : > { %775 = vmax.xlane.f32.xlu1 %v774_v46  ;;  %v762_v47 = vpop.f32.mrf.mxu0 }
 0x2b9   : > { %v1606_v48 = vpop.f32.mrf.mxu0 }
 0x2c8   : > { %862 = vrot.lane.b32.xlu1 %v560_v14, %s1882_s28 }
 0x2c9   : > { %813 = vrot.lane.b32.xlu0 %v2084_v10, %s1882_s28  ;;  %v767_v49 = vpop.xlane.xlu1 %766 }
 0x2ca   : > { %v777_v50 = vsub.f32 %v616_v26, %v767_v49 }
 0x2cc   : > { %v781_v51 = vmul.f32 1.442695, %v777_v50 }
 0x2ce   : > { %1762 = vpow2.f32 %v781_v51 }
 0x2db   : > { %v1763_v52 = vpop.eup %1762 }
 0x2dc   : > { %v789_v53 = vsel %vm574_vm3, %v1763_v52, 0.0 }
 0x2e8   : > { %790 = vadd.xlane.f32.xlu0 %v789_v53 }
 0x338   : > { %v770_v54 = vpop.xlane.xlu0 %769 }
 0x339   : > { %v778_v55 = vsub.f32 %v664_v32, %v770_v54 }
 0x33b   : > { %v783_v56 = vmul.f32 1.442695, %v778_v55 }
 0x33c   : > { %v773_v57 = vpop.xlane.xlu0 %772 }
 0x33d   : > { %1764 = vpow2.f32 %v783_v56  ;;  %v779_v58 = vsub.f32 %v712_v37, %v773_v57 }
 0x33f   : > { %v785_v59 = vmul.f32 1.442695, %v779_v58 }
 0x340   : > { %v814_v60 = vpop.permute.xlu0 %813  ;;  %v776_v61 = vpop.xlane.xlu1 %775 }
 0x341   : > { %1766 = vpow2.f32 %v785_v59  ;;  %v820_v62 = vsel %vm818_vm4, %v814_v60, 0  ;;  %v780_v63 = vsub.f32 %v760_v43, %v776_v61  ;;  %v1032_v59 = vlaneseq }
 0x342   : > { %1608 = vmatpush3.bf16.msra.mxu1 %v820_v62  ;;  %v2171_v62 = vld [vmem:[%s2057_s21] sm:$0xff] }
 0x343   : > { %v787_v0 = vmul.f32 1.442695, %v780_v63  ;;  %1619 = vmatprep.subr.bf16.mxu1 %v1876_v2  ;;  %v2167_v60 = vshrl.u32 %v1032_v59, 7 }
 0x344   : > { %v863_v1 = vpop.permute.xlu1 %862 }
 0x345   : > { %1768 = vpow2.f32 %v787_v0  ;;  %v868_v3 = vsel %vm818_vm4, %v863_v1, 0  ;;  %v1034_v61 = vsub.s32 0, %v2167_v60  ;;  %v1308_v59 = vsub.s32 4, %v2167_v60 }
 0x346   : > { %1614 = vmatpush3.bf16.msra.mxu0 %v868_v3 }
 0x347   : > { %1625 = vmatprep.subr.bf16.mxu0 %v1876_v2  ;;  %v1035_v63 = vrot.slane %v2171_v62, %v1034_v61  ;;  %v1313_v61 = vsub.s32 5, %v2167_v60 }
 0x34a   : > { %v1765_v5 = vpop.eup %1764 }
 0x34b   : > { %v792_v6 = vsel %vm574_vm3, %v1765_v5, 0.0 }
 0x34c   : > { %793 = vadd.xlane.f32.xlu1 %v792_v6 }
 0x34e   : > { %v1767_v7 = vpop.eup %1766 }
 0x34f   : > { %v795_v8 = vsel %vm574_vm3, %v1767_v7, 0.0 }
 0x350   : > { %796 = vadd.xlane.f32.xlu0 %v795_v8 }
 0x352   : > { %v1769_v9 = vpop.eup %1768 }
 0x353   : > { %v798_v10 = vsel %vm574_vm3, %v1769_v9, 0.0 }
 0x354   : > { %799 = vadd.xlane.f32.xlu1 %v798_v10 }
 0x365   : > { %910 = vrot.lane.b32.xlu1 %v2092_v16, %s1882_s28 }
 0x366   : > { %958 = vrot.lane.b32.xlu0 %v2090_v13, %s1882_s28 }
 0x371   : > { %v791_v11 = vpop.xlane.xlu0 %790 }
 0x372   : > { %1770 = vrcp.f32 %v791_v11 }
 0x37f   : > { %v1771_v12 = vpop.eup %1770 }
 0x380   : > { %v805_v14 = vmul.f32 %v1771_v12, %v1763_v52 }
 0x382   : > { %v809_v15 = vpack.c.bf16 %v805_v14, %v805_v14 }
 0x384   : > { %1610 = vmatmul.mubr.msk.bf16.vlgmr.msra.gmra.mxu1 %vm574_vm3, %v809_v15  ;;  %v1752_v15 = vld [vmem:[%s2041_s24 + $0x8] sm:$0xff]  }
 0x385   : > { %1621 = vmatprep.mubr.msk.bf16.mxu1 %vm1877_vm1, %v1876_v2 }
 0x3d5   : > { %v794_v17 = vpop.xlane.xlu1 %793 }
 0x3d6   : > { %1772 = vrcp.f32 %v794_v17  ;;  %v1754_v17 = vld [vmem:[%s2051_s30 + $0x38] sm:$0xff]  }
 0x3d9   : > { %v797_v18 = vpop.xlane.xlu0 %796 }
 0x3da   : > { %1774 = vrcp.f32 %v797_v18  ;;  %v1755_v18 = vld [vmem:[%s2051_s30 + $0x30] sm:$0xff]  }
 0x3dd   : > { %v800_v19 = vpop.xlane.xlu1 %799  ;;  %v959_v22 = vpop.permute.xlu0 %958 }
 0x3de   : > { %1776 = vrcp.f32 %v800_v19  ;;  %v964_v25 = vsel %vm818_vm4, %v959_v22, 0  ;;  %v1756_v19 = vld [vmem:[%s2051_s30 + $0x28] sm:$0xff]  }
 0x3e1   : > { %v911_v16 = vpop.permute.xlu1 %910 }
 0x3e2   : > { %v916_v20 = vsel %vm818_vm4, %v911_v16, 0  ;;  %v1757_v16 = vld [vmem:[%s2051_s30 + $0x20] sm:$0xff]  }
 0x3e3   : > { %v1773_v13 = vpop.eup %1772  ;;  %1620 = vmatpush3.bf16.msra.mxu1 %v916_v20  ;;  %v1758_v20 = vld [vmem:[%s2051_s30 + $0x18] sm:$0xff]  }
 0x3e4   : > { %v806_v21 = vmul.f32 %v1773_v13, %v1765_v5  ;;  %1631 = vmatprep.subr.bf16.mxu1 %v1876_v2  ;;  %v1759_v13 = vld [vmem:[%s2051_s30 + $0x10] sm:$0xff]  }
 0x3e6   : > { %v810_v23 = vpack.c.bf16 %v806_v21, %v806_v21 }
 0x3e7   : > { %v1775_v24 = vpop.eup %1774 }
 0x3e8   : > { %1616 = vmatmul.mubr.msk.bf16.vlgmr.msra.gmra.mxu0 %vm574_vm3, %v810_v23  ;;  %v807_v26 = vmul.f32 %v1775_v24, %v1767_v7  ;;  %v1107_v24 = vsub.s32 1, %v2167_v60 }
 0x3e9   : > { %1626 = vmatpush3.bf16.msra.mxu0 %v964_v25  ;;  %1627 = vmatprep.mubr.msk.bf16.mxu0 %vm1877_vm1, %v1876_v2  ;;  %v1112_v25 = vsub.s32 2, %v2167_v60 }
 0x3ea   : > { %v811_v27 = vpack.c.bf16 %v807_v26, %v807_v26  ;;  %1639 = vmatprep.subr.bf16.mxu0 %v1876_v2  ;;  %v1108_v26 = vrot.slane %v2171_v62, %v1107_v24 }
 0x3eb   : > { %v1777_v28 = vpop.eup %1776 }
 0x3ec   : > { %1622 = vmatmul.mubr.msk.bf16.vlgmr.msra.gmra.mxu1 %vm574_vm3, %v811_v27  ;;  %v808_v29 = vmul.f32 %v1777_v28, %v1769_v9 }
 0x3ed   : > { %1635 = vmatprep.mubr.msk.bf16.mxu1 %vm1877_vm1, %v1876_v2  ;;  %1632 = vmatpush3.bf16.msra.mxu1 %v1750_v35  ;;  %v1521_v35 = vld [vmem:[%s469_s17] ss:$0 sm:$0xff] }
 0x3ee   : > { %v812_v30 = vpack.c.bf16 %v808_v29, %v808_v29  ;;  %1633 = vmatprep.subr.bf16.mxu1 %v1876_v2  ;;  %v1113_v29 = vrot.slane %v2171_v62, %v1112_v25 }
 0x3f0   : > { %1628 = vmatmul.mubr.msk.bf16.vlgmr.msra.gmra.mxu0 %vm574_vm3, %v812_v30 }
 0x3f1   : > { %1643 = vmatprep.mubr.msk.bf16.mxu0 %vm1877_vm1, %v1876_v2  ;;  %1634 = vmatpush3.bf16.msra.mxu1 %v1751_v36 }
 0x3f2   : > { %1647 = vmatprep.subr.bf16.mxu1 %v1876_v2  ;;  %1640 = vmatpush3.bf16.msra.mxu0 %v1752_v15 }
 0x3f3   : > { %1641 = vmatprep.subr.bf16.mxu0 %v1876_v2 }
 0x444   : > { %v856_v31 = vpop.f32.mrf.mxu1 }
 0x445   : > { %v1006_v53 = vpack.c.bf16 %v856_v31, %v856_v31 }
 0x446   : > { %v1611_v32 = vpop.f32.mrf.mxu1 }
 0x448   : > { %v859_v33 = vpop.f32.mrf.mxu1 }
 0x449   : > { %v1760_v33 = vld [vmem:[%s2051_s30 + $0x8] sm:$0xff]  }
 0x44a   : > { %v1612_v34 = vpop.f32.mrf.mxu1 }
 0x44b   : > { %v1761_v34 = vld [vmem:[%s2051_s30] sm:$0xff]   ;;  %s1534_s30 = sshll.u32 %s1862_s13, 7  ;;  %s1788_s13 = scalar_lea.vmem %s1787_s27, 256 }
 0x44c   : > { %s1329_s11 = scalar_lea.hbm %s2307_s0, %s1534_s30  ;;  %p1790_p6 = scmp.lt.s32.totalorder %s1788_s13, %s1782_s16 }
 0x44e   : > { %p1791_p7 = por %p1790_p6, %p1789_p5 }
 0x450   : > { %p1792_p8 = pnand %p1791_p7, %p1785_p4 }
 0x4a8   : > { %v904_v37 = vpop.f32.mrf.mxu0 }
 0x4a9   : > { %v1007_v38 = vpack.c.bf16 %v904_v37, %v904_v37 }
 0x4aa   : > { %v1617_v39 = vpop.f32.mrf.mxu0 }
 0x4ab   : > { %1011 = vrot.lane.b32.xlu1 %v1007_v38, %s1883_s20 }
 0x4ac   : > { %v907_v40 = vpop.f32.mrf.mxu0  ;;  %v952_v41 = vpop.f32.mrf.mxu1 }
 0x4ad   : > { %v1008_v42 = vpack.c.bf16 %v952_v41, %v952_v41 }
 0x4ae   : > { %v1618_v43 = vpop.f32.mrf.mxu0  ;;  %v1623_v44 = vpop.f32.mrf.mxu1 }
 0x4af   : > { %1014 = vrot.lane.b32.xlu0 %v1008_v42, %s1884_s14  ;;  %v1202_v43 = vsub.s32 3, %v2167_v60 }
 0x4b0   : > { %v955_v45 = vpop.f32.mrf.mxu1  ;;  %v1000_v46 = vpop.f32.mrf.mxu0 }
 0x4b1   : > { %v1009_v47 = vpack.c.bf16 %v1000_v46, %v1000_v46  ;;  %v1203_v44 = vrot.slane %v2171_v62, %v1202_v43 }
 0x4b2   : > { %v1624_v48 = vpop.f32.mrf.mxu1  ;;  %v1629_v49 = vpop.f32.mrf.mxu0 }
 0x4b3   : > { %1017 = vrot.lane.b32.xlu1 %v1009_v47, %s1885_s10 }
 0x4b4   : > { %v1003_v50 = vpop.f32.mrf.mxu0 }
 0x4b6   : > { %v1630_v51 = vpop.f32.mrf.mxu0 }
 0x51d   : > { %v1012_v52 = vpop.permute.xlu1 %1011 }
 0x51e   : > { %v1021_v55 = vsel %vm574_vm3, %v1006_v53, %v1012_v52 }
 0x521   : > { %v1015_v54 = vpop.permute.xlu0 %1014 }
 0x522   : > { %v1024_v56 = vsel %vm1022_vm5, %v1021_v55, %v1015_v54 }
 0x525   : > { %v1018_v57 = vpop.permute.xlu1 %1017 }
 0x526   : > { %v1027_v58 = vsel %vm1025_vm6, %v1024_v56, %v1018_v57 }
 0x527   : > { %1636 = vmatmul.mubr.msk.bf16.vlgmr.msra.gmra.mxu1 %vm513_vm2, %v1027_v58 }
 0x528   : > { %1663 = vmatprep.mubr.msk.bf16.mxu1 %vm1877_vm1, %v1876_v2  ;;  %1648 = vmatpush3.bf16.msra.mxu1 %v1754_v17 }
 0x529   : > { %1649 = vmatprep.subr.bf16.mxu1 %v1876_v2 }
 0x52c   : > { %1650 = vmatpush3.bf16.msra.mxu1 %v1755_v18 }
 0x52d   : > { %1651 = vmatprep.subr.bf16.mxu1 %v1876_v2 }
 0x530   : > { %1652 = vmatpush3.bf16.msra.mxu1 %v1756_v19 }
 0x531   : > { %1653 = vmatprep.subr.bf16.mxu1 %v1876_v2 }
 0x534   : > { %1654 = vmatpush3.bf16.msra.mxu1 %v1757_v16 }
 0x535   : > { %1655 = vmatprep.subr.bf16.mxu1 %v1876_v2 }
 0x538   : > { %1656 = vmatpush3.bf16.msra.mxu1 %v1758_v20 }
 0x539   : > { %1657 = vmatprep.subr.bf16.mxu1 %v1876_v2 }
 0x53c   : > { %1658 = vmatpush3.bf16.msra.mxu1 %v1759_v13 }
 0x53d   : > { %1659 = vmatprep.subr.bf16.mxu1 %v1876_v2 }
 0x540   : > { %1660 = vmatpush3.bf16.msra.mxu1 %v1760_v33 }
 0x541   : > { %1661 = vmatprep.subr.bf16.mxu1 %v1876_v2 }
 0x544   : > { %1662 = vmatpush3.bf16.msra.mxu1 %v1761_v34 }
 0x5e7   : > { %v1084_v0 = vpop.f32.mrf.mxu1 }
 0x5e8   : > { %v1085_v1 = vadd.f32 %v1084_v0, %v1035_v63  ;;  %v1309_v63 = vrot.slane %v2171_v62, %v1308_v59 }
 0x5e9   : > { %v1637_v3 = vpop.f32.mrf.mxu1 }
 0x5ea   : > { %v1090_v5 = vadd.f32 %v1085_v1, %v2068_v4  ;;  %v1753_v4 = vld [vmem:[%s2041_s24] sm:$0xff]   ;;  %v1314_v3 = vrot.slane %v2171_v62, %v1313_v61 }
 0x5eb   : > { %v1087_v6 = vpop.f32.mrf.mxu1  ;;  %1642 = vmatpush3.bf16.msra.mxu0 %v1753_v4 }
 0x5ec   : > { %v1091_v7 = vsel %vm513_vm2, %v1090_v5, 0.0 }
 0x5ed   : > { %1092 = vadd.xlane.f32.xlu0 %v1091_v7  ;;  %v1638_v8 = vpop.f32.mrf.mxu1 }
 0x676   : > { %v1093_v9 = vpop.xlane.xlu0 %1092 }
 0x677   : > { %v1095_v10 = vmul.f32 0.03125, %v1093_v9 }
 0x679   : > { %v1096_v11 = vsub.f32 %v1090_v5, %v1095_v10 }
 0x67b   : > { %v1097_v12 = vmul.f32 %v1096_v11, %v1096_v11 }
 0x67d   : > { %v1098_v14 = vsel %vm513_vm2, %v1097_v12, 0.0 }
 0x67e   : > { %1099 = vadd.xlane.f32.xlu1 %v1098_v14 }
 0x707   : > { %v1100_v21 = vpop.xlane.xlu1 %1099 }
 0x708   : > { %v1101_v22 = vmul.f32 0.03125, %v1100_v21 }
 0x70a   : > { %v1102_v23 = vadd.f32 1e-05, %v1101_v22 }
 0x70c   : > { %1778 = vrsqrt.f32 %v1102_v23 }
 0x719   : > { %v1779_v27 = vpop.eup %1778 }
 0x71a   : > { %v1104_v28 = vmul.f32 %v1779_v27, %v1096_v11 }
 0x71c   : > { %v1109_v30 = vmul.f32 %v1108_v26, %v1104_v28 }
 0x71e   : > { %v1114_v31 = vadd.f32 %v1113_v29, %v1109_v30 }
 0x720   : > { %v1115_v32 = vpack.c.bf16 %v1114_v31, %v1114_v31 }
 0x722   : > { %1644 = vmatmul.mubr.msk.bf16.vlgmr.msra.gmra.mxu0 %vm513_vm2, %v1115_v32 }
 0x7e2   : > { %v1176_v36 = vpop.f32.mrf.mxu0 }
 0x7e3   : > { %v1177_v37 = vadd.f32 %v1521_v35, %v1176_v36 }
 0x7e4   : > { %v1645_v38 = vpop.f32.mrf.mxu0 }
 0x7e5   : > { %v1182_v39 = vmax.f32 %v1177_v37, 0.0 }
 0x7e6   : > { %v1179_v40 = vpop.f32.mrf.mxu0 }
 0x7e7   : > { %v1183_v41 = vpack.c.bf16 %v1182_v39, %v1182_v39 }
 0x7e8   : > { %v1646_v42 = vpop.f32.mrf.mxu0 }
 0x7e9   : > { %1664 = vmatmul.mubr.bf16.vlgmr.msra.gmra.mxu1 %v1183_v41 }
 0x8a9   : > { %v1286_v2 = vpop.f32.mrf.mxu1 }
 0x8aa   : > { %v1287_v45 = vadd.f32 %v1286_v2, %v1203_v44 }
 0x8ab   : > { %v1665_v46 = vpop.f32.mrf.mxu1 }
 0x8ac   : > { %v1292_v47 = vadd.f32 %v1287_v45, %v1114_v31 }
 0x8ad   : > { %v1289_v48 = vpop.f32.mrf.mxu1 }
 0x8ae   : > { %v1293_v49 = vsel %vm513_vm2, %v1292_v47, 0.0 }
 0x8af   : > { %1294 = vadd.xlane.f32.xlu0 %v1293_v49  ;;  %v1666_v50 = vpop.f32.mrf.mxu1 }
 0x938   : > { %v1295_v51 = vpop.xlane.xlu0 %1294 }
 0x939   : > { %v1296_v52 = vmul.f32 0.03125, %v1295_v51 }
 0x93b   : > { %v1297_v53 = vsub.f32 %v1292_v47, %v1296_v52 }
 0x93d   : > { %v1298_v54 = vmul.f32 %v1297_v53, %v1297_v53 }
 0x93f   : > { %v1299_v55 = vsel %vm513_vm2, %v1298_v54, 0.0 }
 0x940   : > { %1300 = vadd.xlane.f32.xlu0 %v1299_v55 }
 0x9c9   : > { %v1301_v56 = vpop.xlane.xlu0 %1300 }
 0x9ca   : > { %v1302_v57 = vmul.f32 0.03125, %v1301_v56 }
 0x9cc   : > { %v1303_v58 = vadd.f32 1e-05, %v1302_v57 }
 0x9ce   : > { %1780 = vrsqrt.f32 %v1303_v58 }
 0x9db   : > { %v1781_v0 = vpop.eup %1780 }
 0x9dc   : > { %v1305_v1 = vmul.f32 %v1781_v0, %v1297_v53 }
 0x9de   : > { %v1310_v5 = vmul.f32 %v1309_v63, %v1305_v1 }
 0x9e0   : > { %v1315_v6 = vadd.f32 %v1314_v3, %v1310_v5 }
 0x9e2   : > { %1316 = vst.msk [vmem:[%s2059_s2] sm:$0xff] %vm513_vm2, %v1315_v6 }
 0x9e3   : > { %1795 = shalt.err (!%p1792_p8)
}
 0x9e4   : > { %s1796_s18 = scalar_lea.hbm %s1329_s11, 128  ;;  %s1800_s19 = scalar_lea.hbm %s2307_s0, 256 }
 0x9e5   : > { %p1797_p10 = scmp.ne.s32.totalorder %s1329_s11, %s1796_s18  ;;  %p1801_p13 = scmp.lt.s32.totalorder %s1329_s11, %s2307_s0 }
 0x9e6   : > { %p1802_p0 = scmp.lt.s32.totalorder %s1800_s19, %s1796_s18 }
 0x9e7   : > { %p1798_p11 = pnand %p1797_p10, %p1986_p3 }
 0x9e8   : > { %p1803_p1 = por %p1802_p0, %p1801_p13 }
 0x9e9   : > { %p1799_p12 = pneg %p1798_p11 }
 0x9eb   : > { %p1804_p2 = pnand %p1803_p1, %p1799_p12 }
 0x9ed   : > { %1807 = shalt.err (!%p1804_p2)
}
 0x9ee   : > { %1667 = dma.vmem_to_hbm [thread:$0]  (%p1986_p3), %s1332_s22, 128, %s1329_s11, %s1318_s15  }
 0x9ef PF: > { %s2309_s14 = sld [smem:[#allocation10_spill]] }
 0x9f0   : > { %s2310_s10 = sld [smem:[#allocation5_spill]] }
 0x9f5   : > { %p1673_p4 = scmp.ge.s32.totalorder %s2309_s14, 2 }
 0x9f6   : > { %s1343_s25 = sand.u32 1, %s2310_s10  }
 0x9f7   : > { %p1670_p5 = pnand %p1673_p4, %p1996_p9  ;;  %s1344_s29 = scalar_lea.sflag [#allocation3], %s1343_s25 }
 0x9f9   : > { %p1671_p6 = pneg %p1670_p5 }
 0x9fb   : > { %1841 = dma.done.wait (%p1671_p6), %s1344_s29, 128  }
 0x9fc   : > { %1843 = vsyncadd (%p1671_p6), %s1344_s29, 4294967168  ;;  %s22_s16 = sadd.s32 1, %s2309_s14   ;;  %s2312_s30 = sld [smem:[#allocation6_spill]] }
 0x9fd   : > { %p19_p7 = scmp.ge.s32.totalorder %s22_s16, 6   ;;  %s2313_s10 = sld [smem:[#allocation7_spill]] }
 0x9fe   : > { %s2314_s11 = sld [smem:[#allocation15_spill]] }
 0x9ff   : > { %s2315_s12 = sld [smem:[#allocation8_spill]]  ;;  %21 = sbr.rel (!%p19_p7) target bundleno = 9 (0x9), region = 119 }
 0xa00   : > { %s2316_s13 = sld [smem:[#allocation9_spill]] }
 0xa01   : > { %s2317_s14 = sld [smem:[#allocation11_spill]] }
 0xa02   : > { %s2318_s15 = sld [smem:[#allocation13_spill]] }
 0xa04   :  { %1349 = vsyncpa [#allocation3], 1 }
 0xa05   :  { %1351 = vsyncpa [#allocation3 + $0x1], 1 }

</bundles_post_ra>
